<compile_context>
chip_gen: v7x
topology: tpu7x:2x2x1
jax: 0.10.0
libtpu: 0.0.40
codegen_flags: <defaults>
</compile_context>

<pallas_src>
import jax
import jax.numpy as jnp
from jax.experimental import pallas as pl
from jax.experimental.pallas import tpu as pltpu

WEIGHT_HW = 100
STRIDE = 10
NUM_CHANNELS = 3
LANE = 128  # vreg lane width / MXU tile alignment


def _round_up(n, m):
    return ((n + m - 1) // m) * m


def _model2d_kernel(x_ref, p_ref, out_ref):
    # x_ref:   (B, K_pad)        zero-padded flattened conv filters (one per row)
    # p_ref:   (K_pad, 3*P_pad)  im2col patches; channel c occupies lanes [c*P_pad, (c+1)*P_pad)
    # out_ref: (B, 3)            softmax(max over spatial) per channel
    p_pad = p_ref.shape[1] // NUM_CHANNELS  # = 128, so every slice below is tile-aligned
    # Single MXU matmul: all three channels' strided cross-correlations at once.
    conv = jnp.dot(x_ref[...], p_ref[...],
                   preferred_element_type=jnp.float32)                     # (B, 3*P_pad)
    # Per-channel max over tile-aligned 128-lane views (padding columns replicate a
    # real column, so they never affect the max).  Lane reductions -> XLU slot.
    s = jnp.concatenate(
        [jnp.max(conv[:, c * p_pad:(c + 1) * p_pad], axis=1, keepdims=True)
         for c in range(NUM_CHANNELS)],
        axis=1)                                                             # (B, 3)
    # Numerically stable softmax over the 3 channels.
    m = jnp.max(s, axis=1, keepdims=True)                                   # (B, 1)
    e = jnp.exp(s - m)                                                      # (B, 3)
    out_ref[...] = e / jnp.sum(e, axis=1, keepdims=True)                    # (B, 3)


def prepare_patches(w1, w2, w3, kh, kw, sh=STRIDE, sw=STRIDE):
    """One-time init: three (1,1,100,100) weights -> aligned (K_pad, 3*P_pad) matrix.

    K (= kh*kw) rows are zero-padded up to 128 (dot-safe); each channel's P (= OH*OW)
    columns are padded up to 128 by replicating a real column (max-safe).
    With stride == kernel size the patch extraction is a pure reshape/transpose.
    """
    w = jnp.stack([w1.reshape(WEIGHT_HW, WEIGHT_HW),
                   w2.reshape(WEIGHT_HW, WEIGHT_HW),
                   w3.reshape(WEIGHT_HW, WEIGHT_HW)], axis=0).astype(jnp.float32)
    C, H, W = w.shape
    oh = (H - kh) // sh + 1
    ow = (W - kw) // sw + 1
    if kh == sh and kw == sw and H % kh == 0 and W % kw == 0:
        # (c, oh, i, ow, j) -> (i, j, c, oh, ow): pure reorder, no gather.
        p = w.reshape(C, oh, kh, ow, kw).transpose(2, 4, 0, 1, 3)
    else:
        idx_h = (jnp.arange(oh) * sh)[:, None] + jnp.arange(kh)[None, :]    # (oh, kh)
        idx_w = (jnp.arange(ow) * sw)[:, None] + jnp.arange(kw)[None, :]    # (ow, kw)
        p = w[:, idx_h[:, None, :, None], idx_w[None, :, None, :]]          # (C, oh, ow, kh, kw)
        p = p.transpose(3, 4, 0, 1, 2)                                      # (kh, kw, C, oh, ow)

    K = kh * kw
    P = oh * ow
    p = p.reshape(K, C, P)
    K_pad = _round_up(K, LANE)
    P_pad = _round_up(P, LANE)
    if P_pad > P:
        # Replicate a real column -> padded conv outputs equal a real output (max-safe).
        pad_cols = jnp.broadcast_to(p[:, :, :1], (K, C, P_pad - P))
        p = jnp.concatenate([p, pad_cols], axis=2)
    if K_pad > K:
        # Zero rows in the contraction dim -> contribute exactly 0 to the dot.
        p = jnp.concatenate([p, jnp.zeros((K_pad - K, C, P_pad), jnp.float32)], axis=0)
    # Row k = i*kw + j (then zero pad), column = c*P_pad + spatial position (then replica pad).
    return p.reshape(K_pad, C * P_pad)


def _pad_rows(x_flat, k_pad):
    B, K = x_flat.shape
    if k_pad > K:
        x_flat = jnp.concatenate(
            [x_flat, jnp.zeros((B, k_pad - K), jnp.float32)], axis=1)
    return x_flat


def _run(x_rows, patches):
    B = x_rows.shape[0]
    K_pad, CP = patches.shape
    return pl.pallas_call(
        _model2d_kernel,
        out_shape=jax.ShapeDtypeStruct((B, NUM_CHANNELS), jnp.float32),
        # Single-shot kernel: whole arrays resident in VMEM, no grid / pipelining.
        in_specs=[pl.BlockSpec(memory_space=pltpu.MemorySpace.VMEM),
                  pl.BlockSpec(memory_space=pltpu.MemorySpace.VMEM)],
        out_specs=pl.BlockSpec(memory_space=pltpu.MemorySpace.VMEM),
        cost_estimate=pl.CostEstimate(
            flops=2 * B * K_pad * CP,
            transcendentals=B * NUM_CHANNELS,
            bytes_accessed=4 * (B * K_pad + K_pad * CP + B * NUM_CHANNELS)),
    )(x_rows, patches)


@jax.jit
def model2d_forward(x, patches):
    """x: (KH, KW) float32; patches: (K_pad, 3*P_pad) float32.  Returns (1, 3)."""
    k_pad = patches.shape[0]
    x_row = _pad_rows(x.reshape(1, -1).astype(jnp.float32), k_pad)  # lane-dense row
    return _run(x_row, patches)


@jax.jit
def model2d_forward_batched(xs, patches):
    """xs: (B, KH, KW) float32 -> (B, 3).  Amortizes launch + patches DMA across B."""
    B = xs.shape[0]
    k_pad = patches.shape[0]
    x_rows = _pad_rows(xs.reshape(B, -1).astype(jnp.float32), k_pad)
    return _run(x_rows, patches)


def _reference(x, w1, w2, w3):
    """Pure-JAX reference mirroring the PyTorch forward (for a correctness check)."""
    w = jnp.concatenate([w1, w2, w3], axis=0).astype(jnp.float32)  # (3, 1, 100, 100)
    conv = jax.lax.conv_general_dilated(
        w, x[None, None].astype(jnp.float32),
        window_strides=(STRIDE, STRIDE), padding="VALID",
        dimension_numbers=("NCHW", "OIHW", "NCHW"))                # (3, 1, OH, OW)
    s = jnp.max(conv.reshape(NUM_CHANNELS, -1), axis=-1)           # (3,)
    return jax.nn.softmax(s)[None, :]                              # (1, 3)


def _init_weights(key):
    # torch.nn.init.kaiming_normal_ on (1, 1, 100, 100):
    #   fan_in = 1 * 100 * 100, gain = sqrt(2) (default leaky_relu, a=0)
    std = jnp.sqrt(2.0) / jnp.sqrt(float(WEIGHT_HW * WEIGHT_HW))
    k1, k2, k3 = jax.random.split(key, 3)
    shape = (1, 1, WEIGHT_HW, WEIGHT_HW)
    w1 = std * jax.random.normal(k1, shape, dtype=jnp.float32)
    w2 = std * jax.random.normal(k2, shape, dtype=jnp.float32)
    w3 = std * jax.random.normal(k3, shape, dtype=jnp.float32)
    return w1, w2, w3


if __name__ == "__main__":
    key = jax.random.PRNGKey(0)
    kw_key, kx, kb = jax.random.split(key, 3)
    w1, w2, w3 = _init_weights(kw_key)

    # The module's forward uses x (2D) as a 10x10 conv filter over the 100x100 weights.
    x = jax.random.normal(kx, (10, 10), dtype=jnp.float32)

    # One-time parameter prep (weights are constants): aligned (128, 384) patch matrix.
    patches = jax.block_until_ready(prepare_patches(w1, w2, w3, x.shape[0], x.shape[1]))

    # Single forward (module semantics): (10, 10) -> (1, 3).
    out = jax.block_until_ready(model2d_forward(x, patches))
    ref = _reference(x, w1, w2, w3)
    assert out.shape == (1, NUM_CHANNELS)
    assert jnp.allclose(out, ref, atol=1e-5, rtol=1e-5), (out, ref)

    # Batched forward: amortizes launch + patches DMA; checked row-by-row vs. reference.
    xs = jax.random.normal(kb, (8, 10, 10), dtype=jnp.float32)
    out_b = jax.block_until_ready(model2d_forward_batched(xs, patches))
    ref_b = jnp.concatenate([_reference(xs[i], w1, w2, w3) for i in range(xs.shape[0])], axis=0)
    assert out_b.shape == (8, NUM_CHANNELS)
    assert jnp.allclose(out_b, ref_b, atol=1e-5, rtol=1e-5), (out_b, ref_b)

    print("KERNEL_OK")
</pallas_src>

<mosaic_0001>
module attributes {stable_mosaic.version = 11 : i64} {
  func.func @_model2d_kernel(%arg0: memref<1x128xf32, #tpu.memory_space<vmem>>, %arg1: memref<128x384xf32, #tpu.memory_space<vmem>>, %arg2: memref<1x3xf32, #tpu.memory_space<vmem>>) attributes {dimension_semantics = [], scalar_prefetch = 0 : i64, scratch_operands = 0 : i64, tpu.core_type = #tpu.core_type<tc>} {
    %c0 = arith.constant 0 : index
    %c0_0 = arith.constant 0 : index
    %0 = vector.load %arg0[%c0, %c0_0] : memref<1x128xf32, #tpu.memory_space<vmem>>, vector<1x128xf32>
    %c0_1 = arith.constant 0 : index
    %c0_2 = arith.constant 0 : index
    %1 = vector.load %arg1[%c0_1, %c0_2] : memref<128x384xf32, #tpu.memory_space<vmem>>, vector<128x384xf32>
    %cst = arith.constant dense<0.000000e+00> : vector<1x384xf32>
    %2 = tpu.matmul %0, %1, %cst {dimension_numbers = #tpu.dot_dimension_numbers<[1], [0], [0], [1], [0, 0, 1, 1], [], []>} : vector<1x128xf32>, vector<128x384xf32>, vector<1x384xf32> -> vector<1x384xf32>
    %3 = vector.extract_strided_slice %2 {offsets = [0, 0], sizes = [1, 128], strides = [1, 1]} : vector<1x384xf32> to vector<1x128xf32>
    %cst_3 = arith.constant dense<0xFF800000> : vector<1xf32>
    %4 = vector.multi_reduction <maximumf>, %3, %cst_3 [1] : vector<1x128xf32> to vector<1xf32>
    %5 = vector.shape_cast %4 : vector<1xf32> to vector<1x1xf32>
    %6 = vector.extract_strided_slice %2 {offsets = [0, 128], sizes = [1, 128], strides = [1, 1]} : vector<1x384xf32> to vector<1x128xf32>
    %cst_4 = arith.constant dense<0xFF800000> : vector<1xf32>
    %7 = vector.multi_reduction <maximumf>, %6, %cst_4 [1] : vector<1x128xf32> to vector<1xf32>
    %8 = vector.shape_cast %7 : vector<1xf32> to vector<1x1xf32>
    %9 = vector.extract_strided_slice %2 {offsets = [0, 256], sizes = [1, 128], strides = [1, 1]} : vector<1x384xf32> to vector<1x128xf32>
    %cst_5 = arith.constant dense<0xFF800000> : vector<1xf32>
    %10 = vector.multi_reduction <maximumf>, %9, %cst_5 [1] : vector<1x128xf32> to vector<1xf32>
    %11 = vector.shape_cast %10 : vector<1xf32> to vector<1x1xf32>
    %12 = tpu.concatenate %5, %8, %11 in 1 : vector<1x1xf32>, vector<1x1xf32>, vector<1x1xf32> -> vector<1x3xf32>
    %cst_6 = arith.constant dense<0xFF800000> : vector<1xf32>
    %13 = vector.multi_reduction <maximumf>, %12, %cst_6 [1] : vector<1x3xf32> to vector<1xf32>
    %14 = vector.shape_cast %13 : vector<1xf32> to vector<1x1xf32>
    %15 = vector.broadcast %14 : vector<1x1xf32> to vector<1x3xf32>
    %16 = arith.subf %12, %15 : vector<1x3xf32>
    %17 = math.exp %16 : vector<1x3xf32>
    %cst_7 = arith.constant dense<0.000000e+00> : vector<1xf32>
    %18 = vector.multi_reduction <add>, %17, %cst_7 [1] : vector<1x3xf32> to vector<1xf32>
    %19 = vector.shape_cast %18 : vector<1xf32> to vector<1x1xf32>
    %20 = vector.broadcast %19 : vector<1x1xf32> to vector<1x3xf32>
    %21 = arith.divf %17, %20 : vector<1x3xf32>
    %c0_8 = arith.constant 0 : index
    %c0_9 = arith.constant 0 : index
    %22 = vector.load %arg2[%c0_8, %c0_9] : memref<1x3xf32, #tpu.memory_space<vmem>>, vector<1x3xf32>
    tpu.vector_store %arg2[%c0_8, %c0_9], %21 {strides = array<i32>} : memref<1x3xf32, #tpu.memory_space<vmem>>, vector<1x3xf32>,
    return
  }
}

</mosaic_0001>

<bundles_post_ra>
// kernel: model2d_forward.1
= control target key start
LH: loop header
LB: loop body
LE: loop exit
PB: predicated region body
PF: predicated region fallthrough
CT: control target
= control target key end

     0   :  { %7 = vsyncpa [#allocation3], 0  ;;  %s485_s0 = inlined_call_operand.vmem [shape: f32[1,128], index: 0, kind: input, shape index: {}]   ;;  %s486_s1 = inlined_call_operand.hbm [shape: f32[128,384], index: 1, kind: input, shape index: {}]   ;;  %s487_s2 = inlined_call_operand.hbm [shape: f32[1,3], index: 2, kind: output, shape index: {}]  }
   0x1   :  { %8 = vsyncpa [#allocation4], 0  ;;  %s425_s9 = smov [#allocation2]   ;;  %s377_s13 = scalar_lea.hbm %s486_s1, 6144 }
   0x2   :  { %s16_s10 = sshll.u32 %s425_s9, 4  ;;  %p378_p0 = scmp.ne.s32.totalorder %s486_s1, %s377_s13  ;;  %s17_s10 = int_to_ptr.vmem [resolvable:$true] %s16_s10 }
   0x3   :  { %p381_p1 = scmp.lt.u32.totalorder %s377_s13, %s486_s1 }
   0x5   :  { %p383_p2 = pnand %p381_p1, %p378_p0 }
   0x7   :  { %386 = shalt.err (!%p383_p2)
}
   0x8   :  { %s387_s18 = scalar_lea.vmem %s17_s10, 6144  ;;  %p392_p4 = scmp.lt.s32.totalorder %s17_s10, %s17_s10 }
   0x9   :  { %p388_p3 = scmp.ne.s32.totalorder %s17_s10, %s387_s18  ;;  %p393_p5 = scmp.lt.s32.totalorder %s387_s18, %s387_s18 }
   0xb   :  { %p394_p6 = por %p393_p5, %p392_p4 }
   0xd   :  { %p395_p7 = pnand %p394_p6, %p388_p3 }
   0xf   :  { %398 = shalt.err (!%p395_p7)
}
  0x10   :  { %s426_s19 = smov 384   ;;  %s427_s20 = smov 24  }
  0x11   :  { %22 = dma.hbm_to_vmem [thread:$0]  %s486_s1, 6144, %s17_s10, [#allocation3], %s426_s19, %s426_s19, %s427_s20  }
  0x12   :  { %421 = dma.done.wait [#allocation3], 6144  }
  0x13   :  { %422 = vsyncadd [#allocation3], 4294961152  ;;  %v428_v0 = vmov 0.0|0.0   ;;  %v429_v1 = vmov 0.0   ;;  %vm430_vm0 = vmmov 0   ;;  %v28_v2 = vld [vmem:[#allocation2 + $0x8] sm:$0xff] }
  0x14   :  { %342 = vmatprep.subr.bf16.mxu1 %v428_v0  ;;  %139 = vmatprep.mubr.f32.mxu0 %v429_v1  ;;  %v31_v3 = vld [vmem:[#allocation2 + $0x20] sm:$0xff]  ;;  %v30_v6 = vld [vmem:[#allocation2 + $0x18] sm:$0xff]  ;;  %v37_v8 = vld [vmem:[#allocation2 + $0x50] sm:$0xff]  ;;  %vm216_vm1 = vcmask 1040384   ;;  %vm226_vm2 = vcmask 7168   ;;  %vm228_vm3 = vcmask 15360  }
  0x15   :  { %307 = vmatprep.mubr.msk.f32.mxu1 %vm430_vm0, %v429_v1  ;;  %v27_v4 = vld [vmem:[#allocation2] sm:$0xff]  ;;  %v310_v5 = vpack.c.bf16 %v31_v3, %v28_v2  ;;  %v34_v7 = vld [vmem:[#allocation2 + $0x38] sm:$0xff]  ;;  %v33_v11 = vld [vmem:[#allocation2 + $0x30] sm:$0xff]  ;;  %vm230_vm4 = vcmask 16384  }
  0x16   :  { %v312_v9 = vpack.c.bf16 %v30_v6, %v27_v4  ;;  %v314_v10 = vpack.c.bf16 %v37_v8, %v34_v7  ;;  %v36_v12 = vld [vmem:[#allocation2 + $0x48] sm:$0xff]  ;;  %v29_v13 = vld [vmem:[#allocation2 + $0x10] sm:$0xff]  ;;  %v43_v16 = vld [vmem:[#allocation2 + $0x80] sm:$0xff] }
  0x17   :  { %311 = vmatprep.subr.bf16.mxu0 %v310_v5  ;;  %v32_v14 = vld [vmem:[#allocation2 + $0x28] sm:$0xff]  ;;  %v316_v17 = vpack.c.bf16 %v36_v12, %v33_v11  ;;  %v35_v19 = vld [vmem:[#allocation2 + $0x40] sm:$0xff]  ;;  %v42_v22 = vld [vmem:[#allocation2 + $0x78] sm:$0xff] }
  0x18   :  { %v40_v15 = vld [vmem:[#allocation2 + $0x68] sm:$0xff]  ;;  %313 = vmatpush1.bf16.msra.mxu0 %v312_v9  ;;  %v343_v18 = vpack.c.bf16 %v32_v14, %v29_v13  ;;  %v39_v21 = vld [vmem:[#allocation2 + $0x60] sm:$0xff]  ;;  %v38_v23 = vld [vmem:[#allocation2 + $0x58] sm:$0xff] }
  0x19   :  { %315 = vmatprep.subr.bf16.mxu0 %v314_v10  ;;  %v318_v20 = vpack.c.bf16 %v43_v16, %v40_v15  ;;  %v346_v24 = vpack.c.bf16 %v38_v23, %v35_v19  ;;  %v46_v25 = vld [vmem:[#allocation2 + $0x98] sm:$0xff]  ;;  %v49_v26 = vld [vmem:[#allocation2 + $0xb0] sm:$0xff]  ;;  %v44_v28 = vld [vmem:[#allocation2 + $0x88] sm:$0xff]  ;;  %v320_v29 = vpack.c.bf16 %v42_v22, %v39_v21 }
  0x1a   :  { %344 = vmatpush3.bf16.msra.mxu1 %v343_v18  ;;  %v41_v27 = vld [vmem:[#allocation2 + $0x70] sm:$0xff]  ;;  %v322_v30 = vpack.c.bf16 %v49_v26, %v46_v25  ;;  %v48_v32 = vld [vmem:[#allocation2 + $0xa8] sm:$0xff]  ;;  %v55_v35 = vld [vmem:[#allocation2 + $0xe0] sm:$0xff] }
  0x1b   :  { %345 = vmatprep.subr.bf16.mxu1 %v428_v0  ;;  %v45_v31 = vld [vmem:[#allocation2 + $0x90] sm:$0xff]  ;;  %v349_v33 = vpack.c.bf16 %v44_v28, %v41_v27  ;;  %v52_v34 = vld [vmem:[#allocation2 + $0xc8] sm:$0xff]  ;;  %v47_v36 = vld [vmem:[#allocation2 + $0xa0] sm:$0xff] }
  0x1c   :  { %317 = vmatpush1.bf16.msra.mxu0 %v316_v17  ;;  %v50_v37 = vld [vmem:[#allocation2 + $0xb8] sm:$0xff]  ;;  %v324_v38 = vpack.c.bf16 %v48_v32, %v45_v31  ;;  %v326_v39 = vpack.c.bf16 %v55_v35, %v52_v34  ;;  %v51_v40 = vld [vmem:[#allocation2 + $0xc0] sm:$0xff]  ;;  %v61_v44 = vld [vmem:[#allocation2 + $0x110] sm:$0xff] }
  0x1d   :  { %319 = vmatprep.subr.bf16.mxu0 %v318_v20  ;;  %v54_v41 = vld [vmem:[#allocation2 + $0xd8] sm:$0xff]  ;;  %v352_v42 = vpack.c.bf16 %v50_v37, %v47_v36  ;;  %v53_v45 = vld [vmem:[#allocation2 + $0xd0] sm:$0xff]  ;;  %v56_v46 = vld [vmem:[#allocation2 + $0xe8] sm:$0xff] }
  0x1e   :  { %347 = vmatpush3.bf16.msra.mxu1 %v346_v24  ;;  %v58_v43 = vld [vmem:[#allocation2 + $0xf8] sm:$0xff]  ;;  %v328_v47 = vpack.c.bf16 %v54_v41, %v51_v40  ;;  %v57_v49 = vld [vmem:[#allocation2 + $0xf0] sm:$0xff]  ;;  %v60_v50 = vld [vmem:[#allocation2 + $0x108] sm:$0xff]  ;;  %v355_v51 = vpack.c.bf16 %v56_v46, %v53_v45 }
  0x1f   :  { %348 = vmatprep.subr.bf16.mxu1 %v428_v0  ;;  %v330_v48 = vpack.c.bf16 %v61_v44, %v58_v43  ;;  %v64_v52 = vld [vmem:[#allocation2 + $0x128] sm:$0xff]  ;;  %v67_v53 = vld [vmem:[#allocation2 + $0x140] sm:$0xff]  ;;  %v62_v55 = vld [vmem:[#allocation2 + $0x118] sm:$0xff]  ;;  %v332_v56 = vpack.c.bf16 %v60_v50, %v57_v49 }
  0x20   :  { %321 = vmatpush1.bf16.msra.mxu0 %v320_v29  ;;  %v59_v54 = vld [vmem:[#allocation2 + $0x100] sm:$0xff]  ;;  %v334_v57 = vpack.c.bf16 %v67_v53, %v64_v52  ;;  %v66_v59 = vld [vmem:[#allocation2 + $0x138] sm:$0xff]  ;;  %v73_v62 = vld [vmem:[#allocation2 + $0x170] sm:$0xff] }
  0x21   :  { %323 = vmatprep.subr.bf16.mxu0 %v322_v30  ;;  %v63_v58 = vld [vmem:[#allocation2 + $0x120] sm:$0xff]  ;;  %v358_v60 = vpack.c.bf16 %v62_v55, %v59_v54  ;;  %v70_v61 = vld [vmem:[#allocation2 + $0x158] sm:$0xff]  ;;  %v65_v63 = vld [vmem:[#allocation2 + $0x130] sm:$0xff] }
  0x22   :  { %350 = vmatpush3.bf16.msra.mxu1 %v349_v33  ;;  %v68_v1 = vld [vmem:[#allocation2 + $0x148] sm:$0xff]  ;;  %v336_v2 = vpack.c.bf16 %v66_v59, %v63_v58  ;;  %v338_v3 = vpack.c.bf16 %v73_v62, %v70_v61  ;;  %v69_v4 = vld [vmem:[#allocation2 + $0x150] sm:$0xff]  ;;  %v71_v7 = vld [vmem:[#allocation2 + $0x160] sm:$0xff] }
  0x23   :  { %351 = vmatprep.subr.bf16.mxu1 %v428_v0  ;;  %v72_v5 = vld [vmem:[#allocation2 + $0x168] sm:$0xff]  ;;  %v361_v6 = vpack.c.bf16 %v68_v1, %v65_v63  ;;  %v74_v8 = vld [vmem:[#allocation2 + $0x178] sm:$0xff]  ;;  %v26_v11 = vld [vmem:[%s485_s0] sm:$0x1]  ;;  %s431_s0 = smov [#allocation5]  }
  0x24   :  { %325 = vmatpush1.bf16.msra.mxu0 %v324_v38  ;;  %v340_v9 = vpack.c.bf16 %v72_v5, %v69_v4  ;;  %v364_v10 = vpack.c.bf16 %v74_v8, %v71_v7  ;;  %s249_s24 = sshll.u32 %s431_s0, 4  ;;  %s250_s24 = int_to_ptr.vmem [resolvable:$true] %s249_s24 }
  0x25   :  { %327 = vmatprep.subr.bf16.mxu0 %v326_v39  ;;  %s399_s25 = scalar_lea.vmem %s250_s24, 16  ;;  %s403_s26 = scalar_lea.vmem %s250_s24, 32 }
  0x26   :  { %353 = vmatpush3.bf16.msra.mxu1 %v352_v42  ;;  %p400_p8 = scmp.ne.s32.totalorder %s250_s24, %s399_s25  ;;  %p404_p9 = scmp.lt.s32.totalorder %s250_s24, %s250_s24 }
  0x27   :  { %354 = vmatprep.subr.bf16.mxu1 %v428_v0  ;;  %p405_p10 = scmp.lt.s32.totalorder %s403_s26, %s399_s25 }
  0x28   :  { %329 = vmatpush1.bf16.msra.mxu0 %v328_v47 }
  0x29   :  { %331 = vmatprep.subr.bf16.mxu0 %v330_v48  ;;  %p406_p11 = por %p405_p10, %p404_p9 }
  0x2a   :  { %356 = vmatpush3.bf16.msra.mxu1 %v355_v51 }
  0x2b   :  { %357 = vmatprep.subr.bf16.mxu1 %v428_v0  ;;  %p407_p12 = pnand %p406_p11, %p400_p8 }
  0x2c   :  { %333 = vmatpush1.bf16.msra.mxu0 %v332_v56 }
  0x2d   :  { %335 = vmatprep.subr.bf16.mxu0 %v334_v57 }
  0x2e   :  { %359 = vmatpush3.bf16.msra.mxu1 %v358_v60 }
  0x2f   :  { %360 = vmatprep.subr.bf16.mxu1 %v428_v0 }
  0x30   :  { %337 = vmatpush1.bf16.msra.mxu0 %v336_v2 }
  0x31   :  { %339 = vmatprep.subr.bf16.mxu0 %v338_v3 }
  0x32   :  { %362 = vmatpush3.bf16.msra.mxu1 %v361_v6 }
  0x33   :  { %363 = vmatprep.subr.bf16.mxu1 %v428_v0 }
  0x34   :  { %341 = vmatpush1.bf16.msra.mxu0 %v340_v9 }
  0x36   :  { %365 = vmatpush3.bf16.msra.mxu1 %v364_v10 }
  0x37   :  { %140 = vmatmul.mubr.f32.vlgmr.msra.gmra.mrb[0].mxu0 %v26_v11 }
  0x39   :  { %308 = vmatmul.mubr.f32.vlgmr.msra.gmra.mrb[0].mxu1 %v26_v11 }
 0x10a   :  { %v141_v12 = vpop.f32.mrb[0].mxu0 }
 0x10b   :  { %v143_v13 = vpop.f32.mrb[1].mxu0  ;;  %v217_v14 = vsel %vm216_vm1, %v141_v12, -inf }
 0x10c   :  { %218 = vmax.xlane.f32.xlu0 %v217_v14  ;;  %v212_v15 = vpop.f32.mrb[0].mxu1  ;;  %v220_v18 = vsel %vm216_vm1, %v143_v13, -inf }
 0x10d   :  { %v309_v16 = vpop.f32.mrb[1].mxu1  ;;  %v223_v17 = vsel %vm216_vm1, %v212_v15, -inf }
 0x10e   :  { %224 = vmax.xlane.f32.xlu1 %v223_v17 }
 0x110   :  { %221 = vmax.xlane.f32.xlu0 %v220_v18 }
 0x199   :  { %v219_v0 = vpop.xlane.xlu0 %218 }
 0x19b   :  { %v225_v19 = vpop.xlane.xlu1 %224 }
 0x19d   :  { %v222_v20 = vpop.xlane.xlu0 %221 }
 0x19e   :  { %v227_v21 = vsel %vm226_vm2, %v219_v0, %v222_v20 }
 0x19f   :  { %v229_v22 = vsel %vm228_vm3, %v227_v21, %v225_v19 }
 0x1a0   :  { %v231_v23 = vsel %vm230_vm4, %v229_v22, -inf }
 0x1a1   :  { %232 = vmax.xlane.f32.xlu1 %v231_v23 }
 0x22e   :  { %v233_v24 = vpop.xlane.xlu1 %232 }
 0x22f   :  { %v234_v25 = vsub.f32 %v229_v22, %v233_v24 }
 0x231   :  { %v235_v26 = vmul.f32 1.442695, %v234_v25 }
 0x233   :  { %373 = vpow2.f32 %v235_v26 }
 0x23d   :  { %v374_v27 = vpop.eup %373 }
 0x23e   :  { %v237_v28 = vsel %vm230_vm4, %v374_v27, 0.0 }
 0x23f   :  { %238 = vadd.xlane.f32.xlu0 %v237_v28 }
 0x2cc   :  { %v239_v29 = vpop.xlane.xlu0 %238 }
 0x2cd   :  { %375 = vrcp.f32 %v239_v29 }
 0x2d7   :  { %v376_v30 = vpop.eup %375 }
 0x2d8   :  { %v241_v31 = vmul.f32 %v376_v30, %v374_v27 }
 0x2da   :  { %242 = vst.msk [vmem:[#allocation5] sm:$0x1] %vm230_vm4, %v241_v31 }
 0x2db   :  { %410 = shalt.err (!%p407_p12)
}
 0x2dc   :  { %s411_s29 = scalar_lea.hbm %s487_s2, 16 }
 0x2dd   :  { %p412_p13 = scmp.ne.s32.totalorder %s487_s2, %s411_s29  ;;  %p415_p0 = scmp.lt.u32.totalorder %s411_s29, %s487_s2 }
 0x2df   :  { %p417_p1 = pnand %p415_p0, %p412_p13 }
 0x2e1   :  { %420 = shalt.err (!%p417_p1)
}
 0x2e2   :  { %252 = dma.vmem_to_hbm [thread:$0]  %s250_s24, 16, %s487_s2, [#allocation4]  }
 0x2e3   :  { %423 = dma.done.wait [#allocation4], 16  }
 0x2e4   :  { %424 = vsyncadd [#allocation4], 4294967280 }
 0x2e5   :  { %256 = vsyncpa [#allocation3], 1 }
 0x2e6   :  { %257 = vsyncpa [#allocation4], 1 }

</bundles_post_ra>
